<compile_context>
chip_gen: v6e
topology: v6e:2x2x1
jax: 0.10.0
libtpu: 0.0.40
codegen_flags: <defaults>
</compile_context>

<pallas_src>
import jax
import jax.numpy as jnp
from jax import lax
from jax.experimental import pallas as pl
from jax.experimental.pallas import tpu as pltpu


def _classifier_kernel(x_ref, w_ref, b_ref, o_ref):
    # x_ref: (bm, S, D) -- level L-1 slab, class token is row 0 along S.
    # w_ref: (bc, D)    -- nn.Linear weight layout, NOT transposed.
    # b_ref: (1, bc)
    # o_ref: (bm, bc)
    x_tok = x_ref[:, 0, :]                                   # (bm, D)
    acc = lax.dot_general(
        x_tok, w_ref[...],
        dimension_numbers=(((1,), (1,)), ((), ())),          # contract D with D
        preferred_element_type=jnp.float32)
    o_ref[...] = (acc + b_ref[...]).astype(o_ref.dtype)


def classifier_forward(x, weight, bias, *, bm_max=128, bc_max=512):
    """x: (B, L, S, D); weight: (C, D); bias: (C,). Returns fc(x[:, -1, 0, :]) -> (B, C)."""
    B, L, S, D = x.shape
    C = weight.shape[0]

    # Tile sizes: full dim when small (satisfies the "== full dim" rule for
    # tiny shapes), otherwise hardware-aligned tiles (8-aligned B, 128-aligned C).
    bm = B if B <= bm_max else bm_max            # bm_max is a multiple of 8
    bc = C if C <= bc_max else bc_max            # bc_max is a multiple of 128

    b2d = bias.reshape(1, C)
    grid = (pl.cdiv(B, bm), pl.cdiv(C, bc))

    cost = pl.CostEstimate(
        flops=2 * B * D * C,
        transcendentals=0,
        bytes_accessed=(B * S * D + C * D + C + B * C) * x.dtype.itemsize)

    return pl.pallas_call(
        _classifier_kernel,
        out_shape=jax.ShapeDtypeStruct((B, C), x.dtype),
        grid_spec=pltpu.PrefetchScalarGridSpec(
            num_scalar_prefetch=0,
            grid=grid,
            in_specs=[
                # Gather only the last-level (L-1) slab straight HBM->VMEM;
                # last two block dims are the full (S, D) so tiling is legal
                # for any S, D.  Kernel sees (bm, S, D).
                pl.BlockSpec((bm, pl.Squeezed(), S, D),
                             lambda i, j: (i, L - 1, 0, 0)),
                # Weight tile follows only the C axis.
                pl.BlockSpec((bc, D), lambda i, j: (j, 0)),
                # Bias tile follows only the C axis (not re-DMAed per B tile).
                pl.BlockSpec((1, bc), lambda i, j: (0, j)),
            ],
            out_specs=pl.BlockSpec((bm, bc), lambda i, j: (i, j)),
        ),
        compiler_params=pltpu.CompilerParams(
            dimension_semantics=("parallel", "parallel")),
        cost_estimate=cost,
    )(x, weight, b2d)


if __name__ == "__main__":
    # Small shapes consistent with the forward: x is (B, L, S, D).
    B, L, S, D = 2, 4, 3, 32     # embedding_dim = 32
    C = 8                        # num_classes = 8

    key = jax.random.PRNGKey(0)
    kx, kw, kb = jax.random.split(key, 3)

    x = jax.random.normal(kx, (B, L, S, D), dtype=jnp.float32)
    # Deterministic synthetic parameters (shapes match nn.Linear(D, C)).
    weight = jax.random.normal(kw, (C, D), dtype=jnp.float32) * 0.05
    bias = jax.random.normal(kb, (C,), dtype=jnp.float32) * 0.01

    out = classifier_forward(x, weight, bias)
    jax.block_until_ready(out)

    # Cross-check against plain-JAX reference.
    ref = x[:, -1, 0, :] @ weight.T + bias
    assert out.shape == (B, C)
    assert jnp.allclose(out, ref, atol=1e-5, rtol=1e-5)

    print("KERNEL_OK")
</pallas_src>

<mosaic_0001>
module attributes {stable_mosaic.version = 11 : i64} {
  func.func @_classifier_kernel(%arg0: i32, %arg1: i32, %arg2: memref<2x1x3x32xf32, #tpu.memory_space<vmem>>, %arg3: memref<8x32xf32, #tpu.memory_space<vmem>>, %arg4: memref<1x8xf32, #tpu.memory_space<vmem>>, %arg5: memref<2x8xf32, #tpu.memory_space<vmem>>) attributes {dimension_semantics = [#tpu.dimension_semantics<parallel>, #tpu.dimension_semantics<parallel>], iteration_bounds = array<i64: 1, 1>, scalar_prefetch = 0 : i64, scratch_operands = 0 : i64, tpu.core_type = #tpu.core_type<tc>, window_params = [{transform_indices = @transform_0, window_bounds = array<i64: 2, 1, 3, 32>}, {transform_indices = @transform_1, window_bounds = array<i64: 8, 32>}, {transform_indices = @transform_2, window_bounds = array<i64: 1, 8>}, {transform_indices = @transform_3, window_bounds = array<i64: 2, 8>}]} {
    %c0 = arith.constant 0 : index
    %c0_0 = arith.constant 0 : index
    %c0_1 = arith.constant 0 : index
    %c0_2 = arith.constant 0 : index
    %0 = vector.load %arg2[%c0, %c0_0, %c0_1, %c0_2] : memref<2x1x3x32xf32, #tpu.memory_space<vmem>>, vector<2x1x1x32xf32>
    %1 = vector.shape_cast %0 : vector<2x1x1x32xf32> to vector<2x32xf32>
    %c0_3 = arith.constant 0 : index
    %c0_4 = arith.constant 0 : index
    %2 = vector.load %arg3[%c0_3, %c0_4] : memref<8x32xf32, #tpu.memory_space<vmem>>, vector<8x32xf32>
    %cst = arith.constant dense<0.000000e+00> : vector<2x8xf32>
    %3 = tpu.matmul %1, %2, %cst {dimension_numbers = #tpu.dot_dimension_numbers<[1], [1], [0], [0], [0, 0, 1, 0], [], []>} : vector<2x32xf32>, vector<8x32xf32>, vector<2x8xf32> -> vector<2x8xf32>
    %c0_5 = arith.constant 0 : index
    %c0_6 = arith.constant 0 : index
    %4 = vector.load %arg4[%c0_5, %c0_6] : memref<1x8xf32, #tpu.memory_space<vmem>>, vector<1x8xf32>
    %5 = vector.broadcast %4 : vector<1x8xf32> to vector<2x8xf32>
    %6 = arith.addf %3, %5 : vector<2x8xf32>
    %c0_7 = arith.constant 0 : index
    %c0_8 = arith.constant 0 : index
    %7 = vector.load %arg5[%c0_7, %c0_8] : memref<2x8xf32, #tpu.memory_space<vmem>>, vector<2x8xf32>
    tpu.vector_store %arg5[%c0_7, %c0_8], %6 {strides = array<i32>} : memref<2x8xf32, #tpu.memory_space<vmem>>, vector<2x8xf32>,
    return
  }
  func.func @transform_0(%arg0: i32, %arg1: i32) -> (i32, i32, i32, i32) {
    %c3_i32 = arith.constant 3 : i32
    %c0_i32 = arith.constant 0 : i32
    %c0_i32_0 = arith.constant 0 : i32
    %c0_i32_1 = arith.constant 0 : i32
    return %arg0, %c3_i32, %c0_i32, %c0_i32_0 : i32, i32, i32, i32
  }
  func.func @transform_1(%arg0: i32, %arg1: i32) -> (i32, i32) {
    %c0_i32 = arith.constant 0 : i32
    %c0_i32_0 = arith.constant 0 : i32
    return %arg1, %c0_i32 : i32, i32
  }
  func.func @transform_2(%arg0: i32, %arg1: i32) -> (i32, i32) {
    %c0_i32 = arith.constant 0 : i32
    %c0_i32_0 = arith.constant 0 : i32
    return %c0_i32, %arg1 : i32, i32
  }
  func.func @transform_3(%arg0: i32, %arg1: i32) -> (i32, i32) {
    %c0_i32 = arith.constant 0 : i32
    return %arg0, %arg1 : i32, i32
  }
}

</mosaic_0001>

<bundles_post_ra>
// kernel: tpu_custom_call.1
= control target key start
LH: loop header
LB: loop body
LE: loop exit
PB: predicated region body
PF: predicated region fallthrough
CT: control target
= control target key end

     0   :  { %vm78_vm0 = vcmask 261120   ;;  %v211_v2 = vmov 0.0   ;;  %vm212_vm1 = vmmov 0   ;;  %s251_s0 = inlined_call_operand.vmem [shape: f32[2,4,3,32], index: 0, kind: input, shape index: {}]   ;;  %s252_s1 = inlined_call_operand.vmem [shape: f32[8,32], index: 1, kind: input, shape index: {}]   ;;  %s253_s2 = inlined_call_operand.vmem [shape: f32[1,8], index: 2, kind: input, shape index: {}]   ;;  %s254_s3 = inlined_call_operand.hbm [shape: f32[2,8], index: 3, kind: output, shape index: {}]  }
   0x1   :  { %v65_v0 = vld [vmem:[%s252_s1] sm:$0xff]  ;;  %v174_v1 = vld [vmem:[%s251_s0 + $0xc] sm:$0xf]  ;;  %181 = vmatprep.subr.mxu0 %v211_v2  ;;  %183 = vmatprep.mubr.msk.f32.mxu0 %vm212_vm1, %v211_v2  ;;  %v175_v3 = vld [vmem:[%s251_s0 + $0x1c] sm:$0xf] }
   0x2   :  { %29 = vst [vmem:[#allocation2] sm:$0xf] %v174_v1  ;;  %182 = vmatpush3.xpose.msk.msra.mxu0 %vm78_vm0, %v65_v0  ;;  %31 = vst [vmem:[#allocation2 + $0x4] sm:$0xf] %v175_v3 }
   0x3   :  { %8 = vsyncpa [#allocation4], 0  ;;  %vm76_vm2 = vcmask 1041409   ;;  %v176_v8 = vld [vmem:[%s253_s2] ss:$0 sm:$0xff]  ;;  %s213_s19 = smov [#allocation3]  }
   0x4   :  { %s162_s20 = sshll.u32 %s213_s19, 4  ;;  %vm154_vm3 = vcmask 58368   ;;  %s163_s20 = int_to_ptr.vmem [resolvable:$true] %s162_s20 }
   0x5   :  { %s189_s0 = scalar_lea.vmem %s163_s20, 32  ;;  %p194_p1 = scmp.lt.s32.totalorder %s163_s20, %s163_s20 }
   0x6   :  { %p190_p0 = scmp.ne.s32.totalorder %s163_s20, %s189_s0  ;;  %p195_p2 = scmp.lt.s32.totalorder %s189_s0, %s189_s0 }
   0x8   :  { %p196_p3 = por %p195_p2, %p194_p1 }
   0x9   :  { %v63_v4 = vld [vmem:[#allocation2] sm:$0x1]  ;;  %v64_v5 = vld [vmem:[#allocation2 + $0x4] sm:$0x1] }
   0xa   :  { %v75_v6 = vrot.slane %v64_v5, 7  ;;  %p197_p4 = pnand %p196_p3, %p190_p0 }
   0xc   :  { %v77_v7 = vsel %vm76_vm2, %v75_v6, %v63_v4 }
   0xd   :  { %184 = vmatmul.mubr.msk.f32.vlgmr.msra.gmra.mxu0 %vm78_vm0, %v77_v7 }
  0xcd   :  { %v150_v9 = vpop.f32.mrf.mxu0 }
  0xce   :  { %v151_v10 = vadd.f32 %v176_v8, %v150_v9 }
  0xcf   :  { %v185_v11 = vpop.f32.mrf.mxu0 }
  0xd0   :  { %155 = vst.msk [vmem:[#allocation3] sm:$0x3] %vm154_vm3, %v151_v10 }
  0xd1   :  { %200 = shalt.err (!%p197_p4)
}
  0xd2   :  { %165 = dma.vmem_to_hbm [thread:$0]  %s163_s20, 32, %s254_s3, [#allocation4]  }
  0xd3   :  { %209 = dma.done.wait [#allocation4], 32  }
  0xd4   :  { %210 = vsyncadd [#allocation4], 4294967264 }
  0xd5   :  { %169 = vsyncpa [#allocation4], 1 }

</bundles_post_ra>
